<compile_context>
chip_gen: v7x
topology: tpu7x:2x2x1
jax: 0.10.0
libtpu: 0.0.40
codegen_flags: <defaults>
</compile_context>

<pallas_src>
import functools

import jax
import jax.numpy as jnp
from jax import lax
from jax.experimental import pallas as pl
from jax.experimental.pallas import tpu as pltpu

NEG_INF = -1e30            # finite "minus infinity": masked-row math stays NaN-free
LEAKY_SLOPE = 0.2          # PyG GATConv default negative_slope
LANE = 128
VMEM_LIMIT_BYTES = 32 * 1024 * 1024   # >= v6e/v7x default; raises v5e's 16 MiB default


def _round_up(x, m):
    return ((x + m - 1) // m) * m


def _pick_tiles(n_pad):
    """dst tile (TM) / src tile (TS). Multiples of 256 when possible (MXU-friendly
    on v6e/v7x, still 128-aligned for v5e) and small enough that double-buffered
    adj/h tiles + f32 temporaries stay far below v7x's 64 MiB VMEM."""
    tm = 256 if n_pad % 256 == 0 else 128
    if n_pad % 512 == 0:
        ts = 512
    elif n_pad % 256 == 0:
        ts = 256
    else:
        ts = 128
    return tm, ts


# --------------------------------------------------------------------------
# Kernel 1: linear projection + attention logits
# --------------------------------------------------------------------------
def _gat_proj_kernel(x_ref, w_aug_ref, asrc_w_ref, h_ref, adst_ref, asrc_ref):
    f_out_pad = h_ref.shape[-1]
    x = x_ref[...].astype(jnp.bfloat16)                        # [TM, F_in_pad]
    w_aug = w_aug_ref[...].astype(jnp.bfloat16)                # [F_in_pad, F_out_pad+128]
    h_aug = jnp.dot(x, w_aug, preferred_element_type=jnp.float32)
    h_ref[...] = h_aug[:, :f_out_pad].astype(h_ref.dtype)      # bf16 h for the MXU later
    adst_ref[...] = h_aug[:, f_out_pad:f_out_pad + 1]          # [TM, 1] f32 (folded a_dst)

    # alpha_src as a ROW vector (lane axis = source nodes) so the attention
    # kernel broadcasts it across dst rows with no transpose / no matvec inside
    # the O(N^2) loop.  One tiny MXU matvec per row tile, amortized in O(N*F).
    asrc_w = asrc_w_ref[...].astype(jnp.bfloat16)              # [1, F_in_pad] = (W a_src)^T
    asrc_ref[...] = lax.dot_general(
        asrc_w, x, (((1,), (1,)), ((), ())),
        preferred_element_type=jnp.float32)                    # [1, TM]


# --------------------------------------------------------------------------
# Kernel 2: masked online softmax over source tiles + aggregation
# --------------------------------------------------------------------------
def _gat_attn_kernel(adj_ref, adst_ref, asrc_ref, h_ref, b_ref, out_ref,
                     m_ref, l_ref, acc_ref, *, apply_relu):
    j = pl.program_id(1)

    @pl.when(j == 0)
    def _init():
        m_ref[...] = jnp.full_like(m_ref, NEG_INF)
        l_ref[...] = jnp.zeros_like(l_ref)
        acc_ref[...] = jnp.zeros_like(acc_ref)

    adj = adj_ref[...]                                 # [TM, TS] bf16 in {0, 1}
    # e[i, j] = LeakyReLU(a_dst.h_i + a_src.h_j), masked to neighbours.
    e = adst_ref[...] + asrc_ref[...]                  # [TM,1] + [1,TS] -> [TM, TS]
    e = jnp.maximum(e, LEAKY_SLOPE * e)                # LeakyReLU without compare+select
    e = jnp.where(adj > 0, e, NEG_INF)

    # Online (flash-style) softmax carry across source tiles.
    m_prev = m_ref[...]
    m_new = jnp.maximum(m_prev, jnp.max(e, axis=-1, keepdims=True))
    scale = jnp.exp(m_prev - m_new)                    # [TM, 1] rescale of old state
    # Multiply by adj (0/1) instead of a second where: if a row has seen no
    # valid source yet, m_new == NEG_INF and exp(e - m_new) would be 1 for
    # masked entries; the 0/1 multiply zeroes them.
    p = jnp.exp(e - m_new) * adj.astype(jnp.float32)   # [TM, TS]
    l_ref[...] = scale * l_ref[...] + jnp.sum(p, axis=-1, keepdims=True)
    acc_ref[...] = scale * acc_ref[...] + jnp.dot(
        p.astype(jnp.bfloat16), h_ref[...], preferred_element_type=jnp.float32)
    m_ref[...] = m_new

    @pl.when(j == pl.num_programs(1) - 1)
    def _finalize():
        inv_l = pl.reciprocal(l_ref[...], approx=True)   # EUP slot, not a VPU divide
        out = acc_ref[...] * inv_l + b_ref[...]
        if apply_relu:
            out = jnp.maximum(out, 0.0)
        out_ref[...] = out.astype(out_ref.dtype)


# --------------------------------------------------------------------------
# One GATConv layer = projection call + attention call
# --------------------------------------------------------------------------
def gat_conv(x_pad, adj, w_aug, asrc_w, bias_pad, *, apply_relu, tm, ts):
    n_pad, f_in_pad = x_pad.shape
    f_aug = w_aug.shape[1]
    f_out_pad = f_aug - LANE

    # --- 1) Projection: h (bf16), alpha_dst column, alpha_src row ----------
    h, adst, asrc = pl.pallas_call(
        _gat_proj_kernel,
        grid=(n_pad // tm,),
        in_specs=[
            pl.BlockSpec((tm, f_in_pad), lambda i: (i, 0)),
            pl.BlockSpec((f_in_pad, f_aug), lambda i: (0, 0)),
            pl.BlockSpec((1, f_in_pad), lambda i: (0, 0)),
        ],
        out_specs=[
            pl.BlockSpec((tm, f_out_pad), lambda i: (i, 0)),
            pl.BlockSpec((tm, 1), lambda i: (i, 0)),
            pl.BlockSpec((1, tm), lambda i: (0, i)),
        ],
        out_shape=[
            jax.ShapeDtypeStruct((n_pad, f_out_pad), jnp.bfloat16),
            jax.ShapeDtypeStruct((n_pad, 1), jnp.float32),
            jax.ShapeDtypeStruct((1, n_pad), jnp.float32),
        ],
        compiler_params=pltpu.CompilerParams(
            dimension_semantics=("parallel",),
            vmem_limit_bytes=VMEM_LIMIT_BYTES,
        ),
    )(x_pad, w_aug, asrc_w)

    # --- 2) Attention + aggregation (online softmax over source tiles) -----
    n_dst, n_src = n_pad // tm, n_pad // ts
    cost = pl.CostEstimate(
        flops=2 * n_pad * n_pad * f_out_pad + 10 * n_pad * n_pad,
        transcendentals=n_pad * n_pad,
        bytes_accessed=int(adj.size * adj.dtype.itemsize
                           + n_dst * h.size * h.dtype.itemsize
                           + n_pad * f_out_pad * 4),
    )
    kernel = functools.partial(_gat_attn_kernel, apply_relu=apply_relu)
    out = pl.pallas_call(
        kernel,
        grid=(n_dst, n_src),
        in_specs=[
            pl.BlockSpec((tm, ts), lambda i, j: (i, j)),         # adj tile (bf16 stream)
            pl.BlockSpec((tm, 1), lambda i, j: (i, 0)),          # alpha_dst column
            pl.BlockSpec((1, ts), lambda i, j: (0, j)),          # alpha_src row
            pl.BlockSpec((ts, f_out_pad), lambda i, j: (j, 0)),  # h source rows (bf16)
            pl.BlockSpec((1, f_out_pad), lambda i, j: (0, 0)),   # bias
        ],
        out_specs=pl.BlockSpec((tm, f_out_pad), lambda i, j: (i, 0)),
        out_shape=jax.ShapeDtypeStruct((n_pad, f_out_pad), jnp.float32),
        scratch_shapes=[
            pltpu.VMEM((tm, 1), jnp.float32),           # running max  m
            pltpu.VMEM((tm, 1), jnp.float32),           # running sum  l
            pltpu.VMEM((tm, f_out_pad), jnp.float32),   # running weighted sum
        ],
        compiler_params=pltpu.CompilerParams(
            dimension_semantics=("parallel", "arbitrary"),
            vmem_limit_bytes=VMEM_LIMIT_BYTES,
        ),
        cost_estimate=cost,
    )(adj, adst, asrc, h, bias_pad)
    return out


# --------------------------------------------------------------------------
# Host-side graph / parameter preparation
# --------------------------------------------------------------------------
def build_dense_adj(edge_index, n_pad):
    """adj[dst, src] = 1 for every edge src->dst, plus self-loops, bf16, padded.
    Self-loops on padded rows keep every softmax denominator > 0; padded
    columns stay 0 so real nodes never attend to padding."""
    src, dst = edge_index[0], edge_index[1]
    adj = jnp.zeros((n_pad, n_pad), jnp.float32)
    adj = adj.at[dst, src].set(1.0)
    idx = jnp.arange(n_pad)
    adj = adj.at[idx, idx].set(1.0)        # add_self_loops=True
    return adj.astype(jnp.bfloat16)


def init_gat_conv_params(key, f_in, f_out):
    """Deterministic glorot-style init mirroring GATConv parameter shapes."""
    k_w, k_s, k_d = jax.random.split(key, 3)
    scale_w = jnp.sqrt(6.0 / (f_in + f_out))
    scale_a = jnp.sqrt(6.0 / (1 + f_out))
    w = jax.random.uniform(k_w, (f_in, f_out), jnp.float32, -scale_w, scale_w)
    a_src = jax.random.uniform(k_s, (1, f_out), jnp.float32, -scale_a, scale_a)
    a_dst = jax.random.uniform(k_d, (1, f_out), jnp.float32, -scale_a, scale_a)
    bias = jnp.zeros((f_out,), jnp.float32)
    return (w, a_src, a_dst, bias)


def _pad_layer_params(params, f_in_pad):
    """Pad + fold GATConv params: W_aug = [W | W@a_dst | 0] (lane-padded),
    (W@a_src)^T as a row, and lane-padded bias."""
    w, a_src, a_dst, bias = params
    f_in, f_out = w.shape
    f_out_pad = _round_up(f_out, LANE)
    w_aug = jnp.zeros((f_in_pad, f_out_pad + LANE), jnp.float32)
    w_aug = w_aug.at[:f_in, :f_out].set(w)
    w_aug = w_aug.at[:f_in, f_out_pad].set((w @ a_dst.reshape(f_out, 1)).reshape(f_in))
    asrc_w = jnp.zeros((1, f_in_pad), jnp.float32)
    asrc_w = asrc_w.at[0, :f_in].set((w @ a_src.reshape(f_out, 1)).reshape(f_in))
    bias_pad = jnp.zeros((1, f_out_pad), jnp.float32).at[0, :f_out].set(bias)
    return w_aug, asrc_w, bias_pad


def gat_encoder_forward(x, edge_index, layer_params):
    """GATEncoder.forward: ReLU between layers, none after the last."""
    x = x.astype(jnp.float32)
    n, f_in = x.shape
    n_pad = _round_up(max(n, 8), LANE)
    tm, ts = _pick_tiles(n_pad)

    adj = build_dense_adj(edge_index, n_pad)
    # TODO(synk): fuse both layers into a single pallas_call so the O(N^2)
    # adjacency is streamed from HBM only once per forward pass.

    f_in_pad = _round_up(f_in, LANE)
    cur = jnp.zeros((n_pad, f_in_pad), jnp.float32).at[:n, :f_in].set(x)
    num_layers = len(layer_params)
    for li, params in enumerate(layer_params):
        w_aug, asrc_w, bias_pad = _pad_layer_params(params, cur.shape[1])
        cur = gat_conv(cur, adj, w_aug, asrc_w, bias_pad,
                       apply_relu=(li < num_layers - 1), tm=tm, ts=ts)
    f_out_final = layer_params[-1][0].shape[1]
    return cur[:n, :f_out_final]


if __name__ == "__main__":
    key = jax.random.PRNGKey(0)
    k_x, k_src, k_dst, k_p1, k_p2 = jax.random.split(key, 5)

    num_nodes = 16
    in_channels = 8
    out_channels = 16
    num_edges = 40

    # Deterministic synthetic inputs.
    x = jax.random.normal(k_x, (num_nodes, in_channels), jnp.float32)
    src = jax.random.randint(k_src, (num_edges,), 0, num_nodes)
    dst = jax.random.randint(k_dst, (num_edges,), 0, num_nodes)
    edge_index = jnp.stack([src, dst], axis=0)        # [2, E]

    # layer_num == 2 branch: GATConv(in, 2*out) -> ReLU -> GATConv(2*out, out)
    layer_params = [
        init_gat_conv_params(k_p1, in_channels, 2 * out_channels),
        init_gat_conv_params(k_p2, 2 * out_channels, out_channels),
    ]

    out = gat_encoder_forward(x, edge_index, layer_params)
    jax.block_until_ready(out)
    assert out.shape == (num_nodes, out_channels)
    assert bool(jnp.all(jnp.isfinite(out)))
    print("KERNEL_OK")
</pallas_src>

<mosaic_0001>
module attributes {stable_mosaic.version = 11 : i64} {
  func.func @_gat_proj_kernel(%arg0: i32, %arg1: memref<128x128xf32, #tpu.memory_space<vmem>>, %arg2: memref<128x256xf32, #tpu.memory_space<vmem>>, %arg3: memref<1x128xf32, #tpu.memory_space<vmem>>, %arg4: memref<128x128xbf16, #tpu.memory_space<vmem>>, %arg5: memref<128x1xf32, #tpu.memory_space<vmem>>, %arg6: memref<1x128xf32, #tpu.memory_space<vmem>>) attributes {dimension_semantics = [#tpu.dimension_semantics<parallel>], iteration_bounds = array<i64: 1>, scalar_prefetch = 0 : i64, scratch_operands = 0 : i64, tpu.core_type = #tpu.core_type<tc>, window_params = [{transform_indices = @transform_0, window_bounds = array<i64: 128, 128>}, {pipeline_mode = #tpu.pipeline_mode<synchronous>, transform_indices = @transform_1, window_bounds = array<i64: 128, 256>}, {pipeline_mode = #tpu.pipeline_mode<synchronous>, transform_indices = @transform_2, window_bounds = array<i64: 1, 128>}, {transform_indices = @transform_3, window_bounds = array<i64: 128, 128>}, {transform_indices = @transform_4, window_bounds = array<i64: 128, 1>}, {transform_indices = @transform_5, window_bounds = array<i64: 1, 128>}]} {
    %c0 = arith.constant 0 : index
    %c0_0 = arith.constant 0 : index
    %0 = vector.load %arg1[%c0, %c0_0] : memref<128x128xf32, #tpu.memory_space<vmem>>, vector<128x128xf32>
    %1 = arith.truncf %0 : vector<128x128xf32> to vector<128x128xbf16>
    %c0_1 = arith.constant 0 : index
    %c0_2 = arith.constant 0 : index
    %2 = vector.load %arg2[%c0_1, %c0_2] : memref<128x256xf32, #tpu.memory_space<vmem>>, vector<128x256xf32>
    %3 = arith.truncf %2 : vector<128x256xf32> to vector<128x256xbf16>
    %cst = arith.constant dense<0.000000e+00> : vector<128x256xf32>
    %4 = tpu.matmul %1, %3, %cst {dimension_numbers = #tpu.dot_dimension_numbers<[1], [0], [0], [1], [0, 0, 1, 1], [], []>} : vector<128x128xbf16>, vector<128x256xbf16>, vector<128x256xf32> -> vector<128x256xf32>
    %5 = vector.extract_strided_slice %4 {offsets = [0, 0], sizes = [128, 128], strides = [1, 1]} : vector<128x256xf32> to vector<128x128xf32>
    %6 = arith.truncf %5 : vector<128x128xf32> to vector<128x128xbf16>
    %c0_3 = arith.constant 0 : index
    %c0_4 = arith.constant 0 : index
    %7 = vector.load %arg4[%c0_3, %c0_4] : memref<128x128xbf16, #tpu.memory_space<vmem>>, vector<128x128xbf16>
    tpu.vector_store %arg4[%c0_3, %c0_4], %6 {strides = array<i32>} : memref<128x128xbf16, #tpu.memory_space<vmem>>, vector<128x128xbf16>,
    %8 = vector.extract_strided_slice %4 {offsets = [0, 128], sizes = [128, 1], strides = [1, 1]} : vector<128x256xf32> to vector<128x1xf32>
    %c0_5 = arith.constant 0 : index
    %c0_6 = arith.constant 0 : index
    %9 = vector.load %arg5[%c0_5, %c0_6] : memref<128x1xf32, #tpu.memory_space<vmem>>, vector<128x1xf32>
    tpu.vector_store %arg5[%c0_5, %c0_6], %8 {strides = array<i32>} : memref<128x1xf32, #tpu.memory_space<vmem>>, vector<128x1xf32>,
    %c0_7 = arith.constant 0 : index
    %c0_8 = arith.constant 0 : index
    %10 = vector.load %arg3[%c0_7, %c0_8] : memref<1x128xf32, #tpu.memory_space<vmem>>, vector<1x128xf32>
    %11 = arith.truncf %10 : vector<1x128xf32> to vector<1x128xbf16>
    %cst_9 = arith.constant dense<0.000000e+00> : vector<1x128xf32>
    %12 = tpu.matmul %11, %1, %cst_9 {dimension_numbers = #tpu.dot_dimension_numbers<[1], [1], [0], [0], [0, 0, 1, 0], [], []>} : vector<1x128xbf16>, vector<128x128xbf16>, vector<1x128xf32> -> vector<1x128xf32>
    %c0_10 = arith.constant 0 : index
    %c0_11 = arith.constant 0 : index
    %13 = vector.load %arg6[%c0_10, %c0_11] : memref<1x128xf32, #tpu.memory_space<vmem>>, vector<1x128xf32>
    tpu.vector_store %arg6[%c0_10, %c0_11], %12 {strides = array<i32>} : memref<1x128xf32, #tpu.memory_space<vmem>>, vector<1x128xf32>,
    return
  }
  func.func @transform_0(%arg0: i32) -> (i32, i32) {
    %c0_i32 = arith.constant 0 : i32
    %c0_i32_0 = arith.constant 0 : i32
    return %arg0, %c0_i32 : i32, i32
  }
  func.func @transform_1(%arg0: i32) -> (i32, i32) {
    %c0_i32 = arith.constant 0 : i32
    %c0_i32_0 = arith.constant 0 : i32
    %c0_i32_1 = arith.constant 0 : i32
    return %c0_i32, %c0_i32_0 : i32, i32
  }
  func.func @transform_2(%arg0: i32) -> (i32, i32) {
    %c0_i32 = arith.constant 0 : i32
    %c0_i32_0 = arith.constant 0 : i32
    %c0_i32_1 = arith.constant 0 : i32
    return %c0_i32, %c0_i32_0 : i32, i32
  }
  func.func @transform_3(%arg0: i32) -> (i32, i32) {
    %c0_i32 = arith.constant 0 : i32
    %c0_i32_0 = arith.constant 0 : i32
    return %arg0, %c0_i32 : i32, i32
  }
  func.func @transform_4(%arg0: i32) -> (i32, i32) {
    %c0_i32 = arith.constant 0 : i32
    %c0_i32_0 = arith.constant 0 : i32
    return %arg0, %c0_i32 : i32, i32
  }
  func.func @transform_5(%arg0: i32) -> (i32, i32) {
    %c0_i32 = arith.constant 0 : i32
    %c0_i32_0 = arith.constant 0 : i32
    return %c0_i32, %arg0 : i32, i32
  }
}

</mosaic_0001>

<bundles_post_ra>
// kernel: tpu_custom_call.1
= control target key start
LH: loop header
LB: loop body
LE: loop exit
PB: predicated region body
PF: predicated region fallthrough
CT: control target
= control target key end

     0   :  { %11 = vsyncpa [#allocation3], 0  ;;  %s801_s0 = inlined_call_operand.hbm [shape: f32[128,128], index: 0, kind: input, shape index: {}]   ;;  %s802_s1 = inlined_call_operand.hbm [shape: f32[128,256], index: 1, kind: input, shape index: {}]   ;;  %s803_s2 = inlined_call_operand.vmem [shape: f32[1,128], index: 2, kind: input, shape index: {}]   ;;  %s804_s3 = inlined_call_operand.hbm [shape: bf16[128,128], index: 3, kind: output, shape index: {0}]   ;;  %s805_s4 = inlined_call_operand.vmem [shape: f32[128,1], index: 4, kind: output, shape index: {1}]   ;;  %s806_s5 = inlined_call_operand.hbm [shape: f32[1,128], index: 5, kind: output, shape index: {2}]  }
   0x1   :  { %12 = vsyncpa [#allocation6], 0 }
   0x2   :  { %13 = vsyncpa [#allocation4], 0 }
   0x3   :  { %14 = vsyncpa [#allocation9], 0  ;;  %s626_s18 = smov [#allocation2]   ;;  %s530_s22 = scalar_lea.hbm %s801_s0, 2048 }
   0x4   :  { %s20_s19 = sshll.u32 %s626_s18, 4  ;;  %p531_p0 = scmp.ne.s32.totalorder %s801_s0, %s530_s22  ;;  %s21_s19 = int_to_ptr.vmem [resolvable:$true] %s20_s19 }
   0x5   :  { %p534_p1 = scmp.lt.u32.totalorder %s530_s22, %s801_s0 }
   0x7   :  { %p536_p2 = pnand %p534_p1, %p531_p0 }
   0x9   :  { %539 = shalt.err (!%p536_p2)
}
   0xa   :  { %s540_s27 = scalar_lea.vmem %s21_s19, 2048  ;;  %p545_p4 = scmp.lt.s32.totalorder %s21_s19, %s21_s19 }
   0xb   :  { %p541_p3 = scmp.ne.s32.totalorder %s21_s19, %s540_s27  ;;  %p546_p5 = scmp.lt.s32.totalorder %s540_s27, %s540_s27 }
   0xd   :  { %p547_p6 = por %p546_p5, %p545_p4 }
   0xf   :  { %p548_p7 = pnand %p547_p6, %p541_p3 }
  0x11   :  { %551 = shalt.err (!%p548_p7)
}
  0x12   :  { %s627_s28 = smov 128   ;;  %s628_s29 = smov 8  }
  0x13   :  { %26 = dma.hbm_to_vmem [thread:$0]  %s801_s0, 2048, %s21_s19, [#allocation3], %s627_s28, %s627_s28, %s628_s29  }
  0x14   :  { %s629_s7 = smov [#allocation5]   ;;  %s552_s11 = scalar_lea.hbm %s802_s1, 4096 }
  0x15   :  { %s32_s8 = sshll.u32 %s629_s7, 4  ;;  %p553_p8 = scmp.ne.s32.totalorder %s802_s1, %s552_s11  ;;  %s33_s8 = int_to_ptr.vmem [resolvable:$true] %s32_s8 }
  0x16   :  { %p556_p9 = scmp.lt.u32.totalorder %s552_s11, %s802_s1 }
  0x18   :  { %p558_p10 = pnand %p556_p9, %p553_p8 }
  0x1a   :  { %561 = shalt.err (!%p558_p10)
}
  0x1b   :  { %s562_s16 = scalar_lea.vmem %s33_s8, 4096  ;;  %p567_p12 = scmp.lt.s32.totalorder %s33_s8, %s33_s8 }
  0x1c   :  { %p563_p11 = scmp.ne.s32.totalorder %s33_s8, %s562_s16  ;;  %p568_p13 = scmp.lt.s32.totalorder %s562_s16, %s562_s16 }
  0x1e   :  { %p569_p0 = por %p568_p13, %p567_p12 }
  0x20   :  { %p570_p1 = pnand %p569_p0, %p563_p11 }
  0x22   :  { %573 = shalt.err (!%p570_p1)
}
  0x23   :  { %s630_s0 = smov 256   ;;  %s631_s17 = smov 16  }
  0x24   :  { %38 = dma.hbm_to_vmem [thread:$0]  %s802_s1, 4096, %s33_s8, [#allocation6], %s630_s0, %s630_s0, %s631_s17  }
  0x25   :  { %618 = dma.done.wait [#allocation3], 2048  }
  0x26   :  { %619 = vsyncadd [#allocation3], 4294965248 }
  0x27   :  { %620 = dma.done.wait [#allocation6], 4096  }
  0x28   :  { %621 = vsyncadd [#allocation6], 4294963200  ;;  %v632_v0 = vmov 0.0   ;;  %v633_v1 = vmov 0   ;;  %vm634_vm0 = vmmov 0   ;;  %v73_v2 = vld [vmem:[#allocation5 + $0x8] sm:$0xff] }
  0x29   :  { %497 = vmatprep.subr.bf16.mxu1 %v632_v0  ;;  %152 = vmatprep.mubr.bf16.mxu0 %v633_v1  ;;  %v75_v3 = vld [vmem:[#allocation5 + $0x18] sm:$0xff]  ;;  %v72_v4 = vld [vmem:[#allocation5] sm:$0xff]  ;;  %v74_v6 = vld [vmem:[#allocation5 + $0x10] sm:$0xff]  ;;  %vm313_vm1 = vcmask 7168   ;;  %s635_s15 = smov [#allocation8]  }
  0x2a   :  { %513 = vmatprep.mubr.msk.bf16.mxu1 %vm634_vm0, %v632_v0  ;;  %v105_v5 = vpack.c.bf16 %v75_v3, %v73_v2  ;;  %v77_v7 = vld [vmem:[#allocation5 + $0x28] sm:$0xff]  ;;  %v79_v8 = vld [vmem:[#allocation5 + $0x38] sm:$0xff]  ;;  %v104_v9 = vpack.c.bf16 %v74_v6, %v72_v4  ;;  %v76_v11 = vld [vmem:[#allocation5 + $0x20] sm:$0xff]  ;;  %s393_s16 = sshll.u32 %s635_s15, 4  ;;  %s394_s16 = int_to_ptr.vmem [resolvable:$true] %s393_s16 }
  0x2b   :  { %v107_v10 = vpack.c.bf16 %v79_v8, %v77_v7  ;;  %v78_v12 = vld [vmem:[#allocation5 + $0x30] sm:$0xff]  ;;  %v81_v13 = vld [vmem:[#allocation5 + $0x48] sm:$0xff]  ;;  %v83_v14 = vld [vmem:[#allocation5 + $0x58] sm:$0xff]  ;;  %s574_s18 = scalar_lea.vmem %s394_s16, 16  ;;  %s578_s19 = scalar_lea.vmem %s394_s16, 32 }
  0x2c   :  { %120 = vmatprep.subr.bf16.mxu0 %v105_v5  ;;  %v106_v15 = vpack.c.bf16 %v78_v12, %v76_v11  ;;  %v109_v16 = vpack.c.bf16 %v83_v14, %v81_v13  ;;  %v80_v17 = vld [vmem:[#allocation5 + $0x40] sm:$0xff]  ;;  %v82_v18 = vld [vmem:[#allocation5 + $0x50] sm:$0xff]  ;;  %v85_v19 = vld [vmem:[#allocation5 + $0x68] sm:$0xff]  ;;  %p575_p2 = scmp.ne.s32.totalorder %s394_s16, %s574_s18  ;;  %p579_p3 = scmp.lt.s32.totalorder %s394_s16, %s394_s16 }
  0x2d   :  { %121 = vmatpush1.bf16.msra.mxu0 %v104_v9  ;;  %v87_v20 = vld [vmem:[#allocation5 + $0x78] sm:$0xff]  ;;  %v108_v21 = vpack.c.bf16 %v82_v18, %v80_v17  ;;  %v84_v22 = vld [vmem:[#allocation5 + $0x60] sm:$0xff]  ;;  %v86_v24 = vld [vmem:[#allocation5 + $0x70] sm:$0xff]  ;;  %p580_p4 = scmp.lt.s32.totalorder %s578_s19, %s574_s18 }
  0x2e   :  { %122 = vmatprep.subr.bf16.mxu0 %v107_v10  ;;  %v111_v23 = vpack.c.bf16 %v87_v20, %v85_v19  ;;  %v48_v25 = vld [vmem:[#allocation2] sm:$0xff]  ;;  %v49_v26 = vld [vmem:[#allocation2 + $0x8] sm:$0xff]  ;;  %v91_v28 = vld [vmem:[#allocation5 + $0x98] sm:$0xff]  ;;  %v110_v30 = vpack.c.bf16 %v86_v24, %v84_v22 }
  0x2f   :  { %v89_v27 = vld [vmem:[#allocation5 + $0x88] sm:$0xff]  ;;  %v64_v29 = vpack.c.bf16 %v49_v26, %v48_v25  ;;  %v88_v31 = vld [vmem:[#allocation5 + $0x80] sm:$0xff]  ;;  %v90_v33 = vld [vmem:[#allocation5 + $0x90] sm:$0xff]  ;;  %p581_p5 = por %p580_p4, %p579_p3 }
  0x30   :  { %v113_v32 = vpack.c.bf16 %v91_v28, %v89_v27  ;;  %v50_v34 = vld [vmem:[#allocation2 + $0x10] sm:$0xff]  ;;  %v51_v35 = vld [vmem:[#allocation2 + $0x18] sm:$0xff]  ;;  %v93_v36 = vld [vmem:[#allocation5 + $0xa8] sm:$0xff]  ;;  %v112_v38 = vpack.c.bf16 %v90_v33, %v88_v31 }
  0x31   :  { %123 = vmatpush1.bf16.msra.mxu0 %v106_v15  ;;  %498 = vmatpush3.bf16.xpose.msra.mxu1 %v64_v29  ;;  %v95_v37 = vld [vmem:[#allocation5 + $0xb8] sm:$0xff]  ;;  %v65_v39 = vpack.c.bf16 %v51_v35, %v50_v34  ;;  %v92_v41 = vld [vmem:[#allocation5 + $0xa0] sm:$0xff]  ;;  %v94_v42 = vld [vmem:[#allocation5 + $0xb0] sm:$0xff]  ;;  %p582_p6 = pnand %p581_p5, %p575_p2 }
  0x32   :  { %124 = vmatprep.subr.bf16.mxu0 %v109_v16  ;;  %499 = vmatprep.subr.bf16.mxu1 %v632_v0  ;;  %v115_v40 = vpack.c.bf16 %v95_v37, %v93_v36  ;;  %v97_v43 = vld [vmem:[#allocation5 + $0xc8] sm:$0xff]  ;;  %v99_v44 = vld [vmem:[#allocation5 + $0xd8] sm:$0xff]  ;;  %v114_v45 = vpack.c.bf16 %v94_v42, %v92_v41  ;;  %v96_v46 = vld [vmem:[#allocation5 + $0xc0] sm:$0xff] }
  0x33   :  { %v117_v47 = vpack.c.bf16 %v99_v44, %v97_v43  ;;  %v98_v48 = vld [vmem:[#allocation5 + $0xd0] sm:$0xff]  ;;  %v52_v49 = vld [vmem:[#allocation2 + $0x20] sm:$0xff]  ;;  %v53_v50 = vld [vmem:[#allocation2 + $0x28] sm:$0xff] }
  0x34   :  { %v101_v51 = vld [vmem:[#allocation5 + $0xe8] sm:$0xff]  ;;  %v103_v52 = vld [vmem:[#allocation5 + $0xf8] sm:$0xff]  ;;  %v116_v53 = vpack.c.bf16 %v98_v48, %v96_v46  ;;  %v66_v54 = vpack.c.bf16 %v53_v50, %v52_v49  ;;  %v100_v56 = vld [vmem:[#allocation5 + $0xe0] sm:$0xff] }
  0x35   :  { %125 = vmatpush1.bf16.msra.mxu0 %v108_v21  ;;  %v119_v55 = vpack.c.bf16 %v103_v52, %v101_v51  ;;  %v102_v57 = vld [vmem:[#allocation5 + $0xf0] sm:$0xff]  ;;  %v55_v60 = vld [vmem:[#allocation2 + $0x38] sm:$0xff]  ;;  %v56_v62 = vld [vmem:[#allocation2 + $0x40] sm:$0xff] }
  0x36   :  { %126 = vmatprep.subr.bf16.mxu0 %v111_v23  ;;  %v118_v58 = vpack.c.bf16 %v102_v57, %v100_v56  ;;  %v54_v59 = vld [vmem:[#allocation2 + $0x30] sm:$0xff]  ;;  %v57_v63 = vld [vmem:[#allocation2 + $0x48] sm:$0xff]  ;;  %v59_v4 = vld [vmem:[#allocation2 + $0x58] sm:$0xff] }
  0x37   :  { %v67_v61 = vpack.c.bf16 %v55_v60, %v54_v59  ;;  %v68_v2 = vpack.c.bf16 %v57_v63, %v56_v62  ;;  %v58_v3 = vld [vmem:[#allocation2 + $0x50] sm:$0xff]  ;;  %v60_v6 = vld [vmem:[#allocation2 + $0x60] sm:$0xff]  ;;  %v61_v7 = vld [vmem:[#allocation2 + $0x68] sm:$0xff] }
  0x38   :  { %v69_v5 = vpack.c.bf16 %v59_v4, %v58_v3  ;;  %v70_v8 = vpack.c.bf16 %v61_v7, %v60_v6  ;;  %v62_v9 = vld [vmem:[#allocation2 + $0x70] sm:$0xff]  ;;  %v63_v10 = vld [vmem:[#allocation2 + $0x78] sm:$0xff]  ;;  %v330_v12 = vld [vmem:[%s803_s2] sm:$0x1] }
  0x39   :  { %127 = vmatpush1.bf16.msra.mxu0 %v110_v30  ;;  %500 = vmatpush3.bf16.xpose.msra.mxu1 %v65_v39  ;;  %v71_v11 = vpack.c.bf16 %v63_v10, %v62_v9  ;;  %v331_v13 = vpack.c.bf16 %v330_v12, %v330_v12 }
  0x3a   :  { %128 = vmatprep.subr.bf16.mxu0 %v113_v32  ;;  %501 = vmatprep.subr.bf16.mxu1 %v632_v0 }
  0x3d   :  { %129 = vmatpush1.bf16.msra.mxu0 %v112_v38 }
  0x3e   :  { %130 = vmatprep.subr.bf16.mxu0 %v115_v40 }
  0x41   :  { %131 = vmatpush1.bf16.msra.mxu0 %v114_v45  ;;  %502 = vmatpush3.bf16.xpose.msra.mxu1 %v66_v54 }
  0x42   :  { %132 = vmatprep.subr.bf16.mxu0 %v117_v47  ;;  %503 = vmatprep.subr.bf16.mxu1 %v632_v0 }
  0x45   :  { %133 = vmatpush1.bf16.msra.mxu0 %v116_v53 }
  0x46   :  { %134 = vmatprep.subr.bf16.mxu0 %v119_v55 }
  0x49   :  { %135 = vmatpush1.bf16.msra.mxu0 %v118_v58  ;;  %504 = vmatpush3.bf16.xpose.msra.mxu1 %v67_v61 }
  0x4a   :  { %505 = vmatprep.subr.bf16.mxu1 %v632_v0 }
  0x4c   :  { %153 = vmatmul.mubr.bf16.vlgmr.msra.gmra.mrb[0].mxu0 %v64_v29 }
  0x4d   :  { %162 = vmatprep.mubr.bf16.mxu0 %v633_v1 }
  0x51   :  { %506 = vmatpush3.bf16.xpose.msra.mxu1 %v68_v2 }
  0x52   :  { %507 = vmatprep.subr.bf16.mxu1 %v632_v0 }
  0x54   :  { %163 = vmatmul.mubr.bf16.gmra.mrb[4].mxu0 %v65_v39 }
  0x55   :  { %172 = vmatprep.mubr.bf16.mxu0 %v633_v1 }
  0x59   :  { %508 = vmatpush3.bf16.xpose.msra.mxu1 %v69_v5 }
  0x5a   :  { %509 = vmatprep.subr.bf16.mxu1 %v632_v0 }
  0x5c   :  { %173 = vmatmul.mubr.bf16.gmra.mrb[8].mxu0 %v66_v54 }
  0x5d   :  { %182 = vmatprep.mubr.bf16.mxu0 %v633_v1 }
  0x61   :  { %510 = vmatpush3.bf16.xpose.msra.mxu1 %v70_v8 }
  0x62   :  { %511 = vmatprep.subr.bf16.mxu1 %v632_v0 }
  0x64   :  { %183 = vmatmul.mubr.bf16.gmra.mrb[12].mxu0 %v67_v61 }
  0x65   :  { %192 = vmatprep.mubr.bf16.mxu0 %v633_v1 }
  0x69   :  { %512 = vmatpush3.bf16.xpose.msra.mxu1 %v71_v11 }
  0x6c   :  { %193 = vmatmul.mubr.bf16.gmra.mrb[16].mxu0 %v68_v2 }
  0x6d   :  { %202 = vmatprep.mubr.bf16.mxu0 %v633_v1 }
  0x70   :  { %514 = vmatmul.mubr.bf16.vlgmr.msra.gmra.mrb[0].mxu1 %v331_v13 }
  0x74   :  { %203 = vmatmul.mubr.bf16.gmra.mrb[20].mxu0 %v69_v5 }
  0x75   :  { %212 = vmatprep.mubr.bf16.mxu0 %v633_v1 }
  0x7c   :  { %213 = vmatmul.mubr.bf16.gmra.mrb[24].mxu0 %v70_v8 }
  0x7d   :  { %222 = vmatprep.mubr.bf16.mxu0 %v633_v1 }
  0x84   :  { %223 = vmatmul.mubr.bf16.gmra.mrb[28].mxu0 %v71_v11 }
 0x11f   :  { %v154_v0 = vpop.f32.mrb[0].mxu0 }
 0x120   :  { %v156_v14 = vpop.f32.mrb[1].mxu0 }
 0x121   :  { %314 = vst.msk [vmem:[%s805_s4] sm:$0xff] %vm313_vm1, %v156_v14  ;;  %v158_v15 = vpop.f32.mrb[2].mxu0 }
 0x122   :  { %v444_v16 = vpack.c.bf16 %v158_v15, %v154_v0  ;;  %v160_v17 = vpop.f32.mrb[3].mxu0 }
 0x123   :  { %315 = vst.msk [vmem:[%s805_s4 + $0x8] sm:$0xff] %vm313_vm1, %v160_v17 }
 0x124   :  { %445 = vst [vmem:[#allocation7] sm:$0xff] %v444_v16  }
 0x127   :  { %v164_v18 = vpop.f32.mrb[4].mxu0 }
 0x128   :  { %v166_v1 = vpop.f32.mrb[5].mxu0 }
 0x129   :  { %316 = vst.msk [vmem:[%s805_s4 + $0x10] sm:$0xff] %vm313_vm1, %v166_v1  ;;  %v168_v19 = vpop.f32.mrb[6].mxu0 }
 0x12a   :  { %v449_v20 = vpack.c.bf16 %v168_v19, %v164_v18  ;;  %v170_v21 = vpop.f32.mrb[7].mxu0 }
 0x12b   :  { %317 = vst.msk [vmem:[%s805_s4 + $0x18] sm:$0xff] %vm313_vm1, %v170_v21 }
 0x12c   :  { %481 = vst [vmem:[#allocation7 + $0x8] sm:$0xff] %v449_v20  }
 0x12f   :  { %v174_v22 = vpop.f32.mrb[8].mxu0 }
 0x130   :  { %v176_v23 = vpop.f32.mrb[9].mxu0 }
 0x131   :  { %318 = vst.msk [vmem:[%s805_s4 + $0x20] sm:$0xff] %vm313_vm1, %v176_v23  ;;  %v178_v24 = vpop.f32.mrb[10].mxu0 }
 0x132   :  { %v454_v25 = vpack.c.bf16 %v178_v24, %v174_v22  ;;  %v180_v26 = vpop.f32.mrb[11].mxu0 }
 0x133   :  { %319 = vst.msk [vmem:[%s805_s4 + $0x28] sm:$0xff] %vm313_vm1, %v180_v26 }
 0x134   :  { %482 = vst [vmem:[#allocation7 + $0x10] sm:$0xff] %v454_v25  }
 0x137   :  { %v184_v27 = vpop.f32.mrb[12].mxu0 }
 0x138   :  { %v186_v28 = vpop.f32.mrb[13].mxu0 }
 0x139   :  { %320 = vst.msk [vmem:[%s805_s4 + $0x30] sm:$0xff] %vm313_vm1, %v186_v28  ;;  %v188_v29 = vpop.f32.mrb[14].mxu0 }
 0x13a   :  { %v459_v30 = vpack.c.bf16 %v188_v29, %v184_v27  ;;  %v190_v31 = vpop.f32.mrb[15].mxu0 }
 0x13b   :  { %321 = vst.msk [vmem:[%s805_s4 + $0x38] sm:$0xff] %vm313_vm1, %v190_v31 }
 0x13c   :  { %483 = vst [vmem:[#allocation7 + $0x18] sm:$0xff] %v459_v30  }
 0x13f   :  { %v194_v32 = vpop.f32.mrb[16].mxu0 }
 0x140   :  { %v196_v33 = vpop.f32.mrb[17].mxu0 }
 0x141   :  { %322 = vst.msk [vmem:[%s805_s4 + $0x40] sm:$0xff] %vm313_vm1, %v196_v33  ;;  %v198_v34 = vpop.f32.mrb[18].mxu0 }
 0x142   :  { %v464_v35 = vpack.c.bf16 %v198_v34, %v194_v32  ;;  %v200_v36 = vpop.f32.mrb[19].mxu0 }
 0x143   :  { %323 = vst.msk [vmem:[%s805_s4 + $0x48] sm:$0xff] %vm313_vm1, %v200_v36  ;;  %v366_v38 = vpop.f32.mrb[0].mxu1 }
 0x144   :  { %484 = vst [vmem:[#allocation7 + $0x20] sm:$0xff] %v464_v35   ;;  %372 = vst [vmem:[#allocation8] sm:$0x1] %v366_v38  ;;  %v515_v40 = vpop.f32.mrb[1].mxu1 }
 0x145   :  { %v369_v42 = vpop.f32.mrb[2].mxu1 }
 0x147   :  { %v204_v37 = vpop.f32.mrb[20].mxu0 }
 0x148   :  { %v206_v39 = vpop.f32.mrb[21].mxu0 }
 0x149   :  { %324 = vst.msk [vmem:[%s805_s4 + $0x50] sm:$0xff] %vm313_vm1, %v206_v39  ;;  %v208_v41 = vpop.f32.mrb[22].mxu0 }
 0x14a   :  { %585 = shalt.err (!%p582_p6)
}
 0x14b   :  { %s586_s21 = scalar_lea.hbm %s806_s5, 16 }
 0x14c   :  { %p587_p7 = scmp.ne.s32.totalorder %s806_s5, %s586_s21  ;;  %p590_p8 = scmp.lt.u32.totalorder %s586_s21, %s806_s5 }
 0x14e   :  { %p592_p9 = pnand %p590_p8, %p587_p7 }
 0x150   :  { %595 = shalt.err (!%p592_p9)
}
 0x151   :  { %396 = dma.vmem_to_hbm [thread:$0]  %s394_s16, 16, %s806_s5, [#allocation9]   ;;  %v469_v43 = vpack.c.bf16 %v208_v41, %v204_v37  ;;  %v210_v44 = vpop.f32.mrb[23].mxu0  ;;  %v516_v45 = vpop.f32.mrb[3].mxu1 }
 0x152   :  { %325 = vst.msk [vmem:[%s805_s4 + $0x58] sm:$0xff] %vm313_vm1, %v210_v44  ;;  %v214_v46 = vpop.f32.mrb[24].mxu0  ;;  %s636_s7 = smov [#allocation7]  }
 0x153   :  { %485 = vst [vmem:[#allocation7 + $0x28] sm:$0xff] %v469_v43   ;;  %v216_v47 = vpop.f32.mrb[25].mxu0  ;;  %s378_s8 = sshll.u32 %s636_s7, 4  ;;  %s379_s8 = int_to_ptr.vmem [resolvable:$true] %s378_s8 }
 0x154   :  { %326 = vst.msk [vmem:[%s805_s4 + $0x60] sm:$0xff] %vm313_vm1, %v216_v47  ;;  %v218_v48 = vpop.f32.mrb[26].mxu0  ;;  %s596_s13 = scalar_lea.vmem %s379_s8, 1024  ;;  %p601_p11 = scmp.lt.s32.totalorder %s379_s8, %s379_s8 }
 0x155   :  { %v474_v49 = vpack.c.bf16 %v218_v48, %v214_v46  ;;  %v220_v50 = vpop.f32.mrb[27].mxu0  ;;  %p597_p10 = scmp.ne.s32.totalorder %s379_s8, %s596_s13  ;;  %p602_p12 = scmp.lt.s32.totalorder %s596_s13, %s596_s13 }
 0x156   :  { %327 = vst.msk [vmem:[%s805_s4 + $0x68] sm:$0xff] %vm313_vm1, %v220_v50 }
 0x157   :  { %486 = vst [vmem:[#allocation7 + $0x30] sm:$0xff] %v474_v49   ;;  %v224_v51 = vpop.f32.mrb[28].mxu0  ;;  %p603_p13 = por %p602_p12, %p601_p11 }
 0x158   :  { %v226_v52 = vpop.f32.mrb[29].mxu0 }
 0x159   :  { %328 = vst.msk [vmem:[%s805_s4 + $0x70] sm:$0xff] %vm313_vm1, %v226_v52  ;;  %v228_v53 = vpop.f32.mrb[30].mxu0  ;;  %p604_p0 = pnand %p603_p13, %p597_p10 }
 0x15a   :  { %v479_v54 = vpack.c.bf16 %v228_v53, %v224_v51  ;;  %v230_v55 = vpop.f32.mrb[31].mxu0 }
 0x15b   :  { %329 = vst.msk [vmem:[%s805_s4 + $0x78] sm:$0xff] %vm313_vm1, %v230_v55 }
 0x15c   :  { %487 = vst [vmem:[#allocation7 + $0x38] sm:$0xff] %v479_v54  }
 0x15d   :  { %607 = shalt.err (!%p604_p0)
}
 0x15e   :  { %s608_s16 = scalar_lea.hbm %s804_s3, 1024 }
 0x15f   :  { %p609_p1 = scmp.ne.s32.totalorder %s804_s3, %s608_s16  ;;  %p612_p2 = scmp.lt.u32.totalorder %s608_s16, %s804_s3 }
 0x161   :  { %p614_p3 = pnand %p612_p2, %p609_p1 }
 0x163   :  { %617 = shalt.err (!%p614_p3)
}
 0x164   :  { %s637_s4 = smov 64   ;;  %s638_s1 = smov 4  }
 0x165   :  { %384 = dma.vmem_to_hbm [thread:$0]  %s379_s8, 1024, %s804_s3, [#allocation4], %s637_s4, %s637_s4, %s638_s1  }
 0x166   :  { %622 = dma.done.wait [#allocation4], 1024  }
 0x167   :  { %623 = vsyncadd [#allocation4], 4294966272 }
 0x168   :  { %624 = dma.done.wait [#allocation9], 16  }
 0x169   :  { %625 = vsyncadd [#allocation9], 4294967280 }
 0x16a   :  { %405 = vsyncpa [#allocation3], 1 }
 0x16b   :  { %406 = vsyncpa [#allocation6], 1 }
 0x16c   :  { %407 = vsyncpa [#allocation4], 1 }
 0x16d   :  { %408 = vsyncpa [#allocation9], 1 }

</bundles_post_ra>
